<compile_context>
chip_gen: v5e
topology: v5e:2x2
jax: 0.10.0
libtpu: 0.0.40
codegen_flags: <defaults>
</compile_context>

<pallas_src>
import functools

import jax
import jax.numpy as jnp
from jax import lax
from jax.experimental import pallas as pl
from jax.experimental.pallas import tpu as pltpu

_LANE = 128
_SUBLANE = 8


def _reward_mlp_kernel(obs_ref, act_ref, w1o_ref, w1a_ref, b1_ref, w2_ref,
                       b2_ref, o_ref):
    """One batch tile: (tn, obs_dim), (tn, act_dim) -> (1, tn) sigmoid rewards."""
    # Layer 1: concat([obs, act]) @ W1 expressed as two MXU dots (the (N, 16)
    # concatenated activation is never materialized in HBM).
    h = jnp.dot(obs_ref[...], w1o_ref[...], preferred_element_type=jnp.float32)
    h = h + jnp.dot(act_ref[...], w1a_ref[...],
                    preferred_element_type=jnp.float32)
    h = h + b1_ref[...]                                   # (tn, H) + (1, H)
    h = jnp.where(h > 0, h, jnp.float32(0.01) * h)        # LeakyReLU(0.01)

    # Layer 2, lane-dense: contract hidden of (1, H) with hidden of (tn, H)
    # -> (1, tn). Output block is fully lane-dense, so stores are unmasked
    # full-width vst and the block's VMEM footprint is tiny.
    y = lax.dot_general(w2_ref[...], h, (((1,), (1,)), ((), ())),
                        preferred_element_type=jnp.float32)
    y = y + b2_ref[...]                                    # (1, tn) + (1, 1)

    # Sigmoid; approximate reciprocal runs on the otherwise-idle EUP slot.
    o_ref[...] = pl.reciprocal(1.0 + jnp.exp(-y), approx=True)


def _round_up(x, m):
    return ((x + m - 1) // m) * m


def _choose_batch_tile(n, tile_n):
    """Batch tile: a 128-multiple (<= tile_n) sized for >=2 grid steps when the
    batch is large enough to tile, otherwise a single full-batch block."""
    if n <= _LANE:
        return n                      # full-batch block, always layout-legal
    cap = max(_LANE, (tile_n // _LANE) * _LANE)
    target = _round_up(pl.cdiv(n, 4), _LANE)   # aim for ~4 grid steps
    return min(cap, target)


@functools.partial(jax.jit, static_argnames=("tile_n",))
def reward_model_forward(obs, action, w1, b1, w2, b2, *, tile_n=4096):
    """Pallas implementation of RewardModel.forward.

    obs:    (N, obs_dim)  or (B, T, obs_dim)
    action: (N, act_dim)  or (B, T, act_dim)
    w1: (obs_dim + act_dim, hidden), b1: (hidden,), w2: (hidden, 1), b2: (1,)
    Returns (N, 1) float32 sigmoid rewards in [0, 1] (N = B*T for 3-D inputs),
    matching the PyTorch forward (which returns before r_min/r_max scaling).
    """
    if obs.ndim == 3:
        obs = obs.reshape(-1, obs.shape[-1])
        action = action.reshape(-1, action.shape[-1])

    obs = obs.astype(jnp.float32)       # no-op for f32 inputs: no extra pass
    action = action.astype(jnp.float32)
    n, obs_dim = obs.shape
    act_dim = action.shape[-1]
    hidden = w1.shape[1]

    # Weight-only reshapes/splits (a few KiB); VMEM-resident across the grid.
    w1_obs = w1[:obs_dim, :].astype(jnp.float32)          # (obs_dim, hidden)
    w1_act = w1[obs_dim:, :].astype(jnp.float32)          # (act_dim, hidden)
    b1_2d = b1.reshape(1, hidden).astype(jnp.float32)
    w2_row = w2.reshape(1, hidden).astype(jnp.float32)
    b2_2d = b2.reshape(1, 1).astype(jnp.float32)

    tn = _choose_batch_tile(n, tile_n)
    grid = (pl.cdiv(n, tn),)

    # VMEM budget from lane/sublane-padded block bytes (x2 double buffering),
    # plus headroom; stays far below v7x's 64 MiB/TC even at tile_n=4096.
    block_bytes = 4 * (tn * _round_up(obs_dim, _LANE)        # obs tile
                       + tn * _round_up(act_dim, _LANE)      # act tile
                       + _SUBLANE * tn)                      # (1, tn) out tile
    resident_bytes = 4 * (
        _round_up(obs_dim, _SUBLANE) * _round_up(hidden, _LANE)
        + _round_up(act_dim, _SUBLANE) * _round_up(hidden, _LANE)
        + 3 * _SUBLANE * _LANE)                              # b1, w2, b2
    vmem_limit = min(48 * 1024 * 1024,
                     2 * (block_bytes + resident_bytes) + (4 << 20))

    cost = pl.CostEstimate(
        flops=2 * n * (obs_dim + act_dim) * hidden + 6 * n * hidden,
        transcendentals=n,
        bytes_accessed=4 * (n * (obs_dim + act_dim) + n
                            + (obs_dim + act_dim) * hidden + 2 * hidden + 2),
    )

    out_row = pl.pallas_call(
        _reward_mlp_kernel,
        out_shape=jax.ShapeDtypeStruct((1, n), jnp.float32),
        grid=grid,
        in_specs=[
            pl.BlockSpec((tn, obs_dim), lambda i: (i, 0)),       # streamed
            pl.BlockSpec((tn, act_dim), lambda i: (i, 0)),       # streamed
            pl.BlockSpec((obs_dim, hidden), lambda i: (0, 0)),   # VMEM-resident
            pl.BlockSpec((act_dim, hidden), lambda i: (0, 0)),   # VMEM-resident
            pl.BlockSpec((1, hidden), lambda i: (0, 0)),         # VMEM-resident
            pl.BlockSpec((1, hidden), lambda i: (0, 0)),         # VMEM-resident
            pl.BlockSpec((1, 1), lambda i: (0, 0)),              # VMEM-resident
        ],
        out_specs=pl.BlockSpec((1, tn), lambda i: (0, i)),       # lane-dense
        compiler_params=pltpu.CompilerParams(
            dimension_semantics=("parallel",),   # megacore-shard batch steps
            vmem_limit_bytes=vmem_limit,
        ),
        cost_estimate=cost,
    )(obs, action, w1_obs, w1_act, b1_2d, w2_row, b2_2d)

    return out_row.reshape(n, 1)


def compute_reward(obs_1d, action_1d, params, r_min, r_max):
    """RewardModel.compute_reward: forward on a single pair + [r_min, r_max] scale."""
    w1, b1, w2, b2 = params
    r = reward_model_forward(obs_1d[None, :], action_1d[None, :], w1, b1, w2, b2)
    return float(r[0, 0]) * (r_max - r_min) + r_min


def init_params(key, obs_dim, action_dim, hidden_dim):
    """Deterministic PyTorch-Linear-style init (uniform +/- 1/sqrt(fan_in))."""
    d_in = obs_dim + action_dim
    k1, k2, k3, k4 = jax.random.split(key, 4)
    bound1 = float(d_in) ** -0.5
    bound2 = float(hidden_dim) ** -0.5
    w1 = jax.random.uniform(k1, (d_in, hidden_dim), jnp.float32, -bound1, bound1)
    b1 = jax.random.uniform(k2, (hidden_dim,), jnp.float32, -bound1, bound1)
    w2 = jax.random.uniform(k3, (hidden_dim, 1), jnp.float32, -bound2, bound2)
    b2 = jax.random.uniform(k4, (1,), jnp.float32, -bound2, bound2)
    return w1, b1, w2, b2


def _reference_forward(obs, action, w1, b1, w2, b2):
    """Pure-JAX f32 reference (exact PyTorch math)."""
    if obs.ndim == 3:
        obs = obs.reshape(-1, obs.shape[-1])
        action = action.reshape(-1, action.shape[-1])
    x = jnp.concatenate([obs, action], axis=-1)
    h = x @ w1 + b1
    h = jnp.where(h > 0, h, 0.01 * h)
    return jax.nn.sigmoid(h @ w2 + b2)


if __name__ == "__main__":
    obs_dim, action_dim, hidden_dim = 12, 4, 32
    batch = 200
    r_min, r_max = -1.0, 1.0

    key = jax.random.PRNGKey(0)
    kp, ko, ka = jax.random.split(key, 3)
    params = init_params(kp, obs_dim, action_dim, hidden_dim)
    w1, b1, w2, b2 = params

    obs = jax.random.normal(ko, (batch, obs_dim), jnp.float32)
    action = jax.random.normal(ka, (batch, action_dim), jnp.float32)

    # Default path: n=200 -> tn=128, grid=(2,): exercises pipelining,
    # megacore-parallel batch steps and the ragged tail block.
    rewards = jax.block_until_ready(
        reward_model_forward(obs, action, w1, b1, w2, b2))

    # Small-batch path: single full-batch block (n <= 128).
    rewards_small = jax.block_until_ready(
        reward_model_forward(obs[:64], action[:64], w1, b1, w2, b2))

    # 3-D (B, T, d) path used by update(); returns (B*T, 1) like the reference
    # forward (which returns before reshaping back).
    obs_bt = obs.reshape(4, 50, obs_dim)
    act_bt = action.reshape(4, 50, action_dim)
    rewards_bt = jax.block_until_ready(
        reward_model_forward(obs_bt, act_bt, w1, b1, w2, b2))

    ref = _reference_forward(obs, action, w1, b1, w2, b2)

    assert rewards.shape == (batch, 1)
    assert rewards_small.shape == (64, 1)
    assert rewards_bt.shape == (batch, 1)
    assert jnp.allclose(rewards, ref, atol=2e-3, rtol=2e-3)
    assert jnp.allclose(rewards_small, ref[:64], atol=2e-3, rtol=2e-3)
    assert jnp.allclose(rewards_bt, ref, atol=2e-3, rtol=2e-3)
    assert bool(jnp.all((rewards >= 0.0) & (rewards <= 1.0)))

    # compute_reward: single-pair forward + rescaling to [r_min, r_max].
    r0 = compute_reward(obs[0], action[0], params, r_min, r_max)
    assert r_min <= r0 <= r_max

    # TODO(synk): update() (AdamW optimizer step + Bradley-Terry cross-entropy
    # loss) is training/host logic, not part of the forward kernel.
    print("KERNEL_OK")
</pallas_src>

<mosaic_0001>
module attributes {stable_mosaic.version = 11 : i64} {
  func.func @_reward_mlp_kernel(%arg0: i32, %arg1: memref<128x12xf32, #tpu.memory_space<vmem>>, %arg2: memref<128x4xf32, #tpu.memory_space<vmem>>, %arg3: memref<12x32xf32, #tpu.memory_space<vmem>>, %arg4: memref<4x32xf32, #tpu.memory_space<vmem>>, %arg5: memref<1x32xf32, #tpu.memory_space<vmem>>, %arg6: memref<1x32xf32, #tpu.memory_space<vmem>>, %arg7: memref<1x1xf32, #tpu.memory_space<vmem>>, %arg8: memref<1x128xf32, #tpu.memory_space<vmem>>) attributes {dimension_semantics = [#tpu.dimension_semantics<parallel>], iteration_bounds = array<i64: 2>, scalar_prefetch = 0 : i64, scratch_operands = 0 : i64, tpu.core_type = #tpu.core_type<tc>, window_params = [{transform_indices = @transform_0, window_bounds = array<i64: 128, 12>}, {transform_indices = @transform_1, window_bounds = array<i64: 128, 4>}, {pipeline_mode = #tpu.pipeline_mode<synchronous>, transform_indices = @transform_2, window_bounds = array<i64: 12, 32>}, {pipeline_mode = #tpu.pipeline_mode<synchronous>, transform_indices = @transform_3, window_bounds = array<i64: 4, 32>}, {pipeline_mode = #tpu.pipeline_mode<synchronous>, transform_indices = @transform_4, window_bounds = array<i64: 1, 32>}, {pipeline_mode = #tpu.pipeline_mode<synchronous>, transform_indices = @transform_5, window_bounds = array<i64: 1, 32>}, {pipeline_mode = #tpu.pipeline_mode<synchronous>, transform_indices = @transform_6, window_bounds = array<i64: 1, 1>}, {transform_indices = @transform_7, window_bounds = array<i64: 1, 128>}]} {
    %c0 = arith.constant 0 : index
    %c0_0 = arith.constant 0 : index
    %0 = vector.load %arg1[%c0, %c0_0] : memref<128x12xf32, #tpu.memory_space<vmem>>, vector<128x12xf32>
    %c0_1 = arith.constant 0 : index
    %c0_2 = arith.constant 0 : index
    %1 = vector.load %arg3[%c0_1, %c0_2] : memref<12x32xf32, #tpu.memory_space<vmem>>, vector<12x32xf32>
    %cst = arith.constant dense<0.000000e+00> : vector<128x32xf32>
    %2 = tpu.matmul %0, %1, %cst {dimension_numbers = #tpu.dot_dimension_numbers<[1], [0], [0], [1], [0, 0, 1, 1], [], []>} : vector<128x12xf32>, vector<12x32xf32>, vector<128x32xf32> -> vector<128x32xf32>
    %c0_3 = arith.constant 0 : index
    %c0_4 = arith.constant 0 : index
    %3 = vector.load %arg2[%c0_3, %c0_4] : memref<128x4xf32, #tpu.memory_space<vmem>>, vector<128x4xf32>
    %c0_5 = arith.constant 0 : index
    %c0_6 = arith.constant 0 : index
    %4 = vector.load %arg4[%c0_5, %c0_6] : memref<4x32xf32, #tpu.memory_space<vmem>>, vector<4x32xf32>
    %cst_7 = arith.constant dense<0.000000e+00> : vector<128x32xf32>
    %5 = tpu.matmul %3, %4, %cst_7 {dimension_numbers = #tpu.dot_dimension_numbers<[1], [0], [0], [1], [0, 0, 1, 1], [], []>} : vector<128x4xf32>, vector<4x32xf32>, vector<128x32xf32> -> vector<128x32xf32>
    %6 = arith.addf %2, %5 : vector<128x32xf32>
    %c0_8 = arith.constant 0 : index
    %c0_9 = arith.constant 0 : index
    %7 = vector.load %arg5[%c0_8, %c0_9] : memref<1x32xf32, #tpu.memory_space<vmem>>, vector<1x32xf32>
    %8 = vector.broadcast %7 : vector<1x32xf32> to vector<128x32xf32>
    %9 = arith.addf %6, %8 : vector<128x32xf32>
    %cst_10 = arith.constant 0.000000e+00 : f32
    %10 = vector.broadcast %cst_10 : f32 to vector<128x32xf32>
    %11 = arith.cmpf ogt, %9, %10 : vector<128x32xf32>
    %cst_11 = arith.constant 0.00999999977 : f32
    %12 = vector.broadcast %cst_11 : f32 to vector<128x32xf32>
    %13 = arith.mulf %12, %9 : vector<128x32xf32>
    %14 = arith.select %11, %9, %13 : vector<128x32xi1>, vector<128x32xf32>
    %c0_12 = arith.constant 0 : index
    %c0_13 = arith.constant 0 : index
    %15 = vector.load %arg6[%c0_12, %c0_13] : memref<1x32xf32, #tpu.memory_space<vmem>>, vector<1x32xf32>
    %cst_14 = arith.constant dense<0.000000e+00> : vector<1x128xf32>
    %16 = tpu.matmul %15, %14, %cst_14 {dimension_numbers = #tpu.dot_dimension_numbers<[1], [1], [0], [0], [0, 0, 1, 0], [], []>} : vector<1x32xf32>, vector<128x32xf32>, vector<1x128xf32> -> vector<1x128xf32>
    %c0_15 = arith.constant 0 : index
    %c0_16 = arith.constant 0 : index
    %17 = vector.load %arg7[%c0_15, %c0_16] : memref<1x1xf32, #tpu.memory_space<vmem>>, vector<1x1xf32>
    %18 = vector.broadcast %17 : vector<1x1xf32> to vector<1x128xf32>
    %19 = arith.addf %16, %18 : vector<1x128xf32>
    %cst_17 = arith.constant 0.000000e+00 : f32
    %20 = vector.broadcast %cst_17 : f32 to vector<1x128xf32>
    %21 = arith.subf %20, %19 : vector<1x128xf32>
    %22 = math.exp %21 : vector<1x128xf32>
    %cst_18 = arith.constant 1.000000e+00 : f32
    %23 = vector.broadcast %cst_18 : f32 to vector<1x128xf32>
    %24 = arith.addf %23, %22 : vector<1x128xf32>
    %25 = tpu.reciprocal %24 {approx = true} : vector<1x128xf32> -> vector<1x128xf32>
    %c0_19 = arith.constant 0 : index
    %c0_20 = arith.constant 0 : index
    %26 = vector.load %arg8[%c0_19, %c0_20] : memref<1x128xf32, #tpu.memory_space<vmem>>, vector<1x128xf32>
    tpu.vector_store %arg8[%c0_19, %c0_20], %25 {strides = array<i32>} : memref<1x128xf32, #tpu.memory_space<vmem>>, vector<1x128xf32>,
    return
  }
  func.func @transform_0(%arg0: i32) -> (i32, i32) {
    %c0_i32 = arith.constant 0 : i32
    %c0_i32_0 = arith.constant 0 : i32
    return %arg0, %c0_i32 : i32, i32
  }
  func.func @transform_1(%arg0: i32) -> (i32, i32) {
    %c0_i32 = arith.constant 0 : i32
    %c0_i32_0 = arith.constant 0 : i32
    return %arg0, %c0_i32 : i32, i32
  }
  func.func @transform_2(%arg0: i32) -> (i32, i32) {
    %c0_i32 = arith.constant 0 : i32
    %c0_i32_0 = arith.constant 0 : i32
    %c0_i32_1 = arith.constant 0 : i32
    return %c0_i32, %c0_i32_0 : i32, i32
  }
  func.func @transform_3(%arg0: i32) -> (i32, i32) {
    %c0_i32 = arith.constant 0 : i32
    %c0_i32_0 = arith.constant 0 : i32
    %c0_i32_1 = arith.constant 0 : i32
    return %c0_i32, %c0_i32_0 : i32, i32
  }
  func.func @transform_4(%arg0: i32) -> (i32, i32) {
    %c0_i32 = arith.constant 0 : i32
    %c0_i32_0 = arith.constant 0 : i32
    %c0_i32_1 = arith.constant 0 : i32
    return %c0_i32, %c0_i32_0 : i32, i32
  }
  func.func @transform_5(%arg0: i32) -> (i32, i32) {
    %c0_i32 = arith.constant 0 : i32
    %c0_i32_0 = arith.constant 0 : i32
    %c0_i32_1 = arith.constant 0 : i32
    return %c0_i32, %c0_i32_0 : i32, i32
  }
  func.func @transform_6(%arg0: i32) -> (i32, i32) {
    %c0_i32 = arith.constant 0 : i32
    %c0_i32_0 = arith.constant 0 : i32
    %c0_i32_1 = arith.constant 0 : i32
    return %c0_i32, %c0_i32_0 : i32, i32
  }
  func.func @transform_7(%arg0: i32) -> (i32, i32) {
    %c0_i32 = arith.constant 0 : i32
    %c0_i32_0 = arith.constant 0 : i32
    return %c0_i32, %arg0 : i32, i32
  }
}

</mosaic_0001>

<bundles_post_ra>
// kernel: reward_model_forward.1
= control target key start
LH: loop header
LB: loop body
LE: loop exit
PB: predicated region body
PF: predicated region fallthrough
CT: control target
= control target key end

     0   :  { %s1293_s0 = inlined_call_operand.vmem [shape: f32[200,12], index: 0, kind: input, shape index: {}]   ;;  %s1294_s1 = inlined_call_operand.vmem [shape: f32[200,4], index: 1, kind: input, shape index: {}]   ;;  %s1295_s2 = inlined_call_operand.vmem [shape: f32[12,32], index: 2, kind: input, shape index: {}]   ;;  %s1296_s3 = inlined_call_operand.vmem [shape: f32[4,32], index: 3, kind: input, shape index: {}]   ;;  %s1297_s4 = inlined_call_operand.vmem [shape: f32[1,32], index: 4, kind: input, shape index: {}]   ;;  %s1298_s5 = inlined_call_operand.vmem [shape: f32[1,32], index: 5, kind: input, shape index: {}]   ;;  %s1299_s6 = inlined_call_operand.<no memory space> [shape: f32[1,1], index: 6, kind: input, shape index: {}]   ;;  %s1300_s7 = inlined_call_operand.hbm [shape: f32[1,200], index: 7, kind: output, shape index: {}]  }
   0x1   :  { %v12_v0 = vstv %s1299_s6 }
   0x2   :  { %13 = vst [vmem:[#allocation2] sm:$0x1] %v12_v0 }
   0x3   :  { %14 = vsyncpa [#allocation4], 0 }
   0x4   :  { %16 = vsyncpa [#allocation4 + $0x1], 0  ;;  %s1064_s26 = smov 0   ;;  %s1066_s27 = smov 0  }
   0x5   :  { %s1068_s28 = smov 0   ;;  %s1070_s29 = smov 0  }
   0x6 LB: > { %s1085_s6 = sadd.s32 4294967295, %s1018_s29   ;;  %s846_s30 = sadd.s32 4294967294, %s1018_s29   ;;  %s1018_s29 = sphi %s1070_s29, %s1306_s29   ;;  %s1014_s28 = sphi %s1068_s28, %s1305_s28   ;;  %s1010_s27 = sphi %s1066_s27, %s1304_s27   ;;  %s1006_s26 = sphi %s1064_s26, %s1303_s26  }
   0x7   : > { %s1089_s8 = sadd.s32 1, %s1018_s29   ;;  %s186_s9 = sadd.s32 1, %s1014_s28 }
   0x8   : > { %s183_s10 = ssub.s32 %s1018_s29, %s1089_s8  ;;  %p196_p0 = scmp.ne.s32.totalorder %s1014_s28, %s1010_s27 }
   0x9   : > { %p184_p1 = scmp.eq.s32.totalorder %s183_s10, 0  ;;  %p197_p2 = scmp.eq.s32.totalorder %s1085_s6, 1 }
   0xa   : > { %p202_p3 = scmp.ne.s32.totalorder %s1010_s27, %s1006_s26  ;;  %p203_p4 = scmp.eq.s32.totalorder %s846_s30, 1 }
   0xb   : > { %s1100_s11 = scalar_select %p184_p1, %s1014_s28, %s186_s9  }
   0xc   : > { %p1102_p5 = por %p197_p2, %p196_p0  ;;  %p1106_p6 = por %p203_p4, %p202_p3 }
   0xd   : > { %p849_p7 = scmp.ge.s32.totalorder %s1018_s29, 1  ;;  %p270_p8 = scmp.lt.s32.totalorder %s1018_s29, 3 }
   0xf   : > { %p271_p9 = pnand %p849_p7, %p270_p8 }
  0x10   : > { %s850_s16 = sshll.u32 (!%p271_p9), %s1085_s6, 4  ;;  %s312_s17 = sand.u32 (!%p271_p9), 1, %s1010_s27  }
  0x11   : > { %274 = sbr.rel (%p271_p9) target bundleno = 467 (0x1d3), region = 48  ;;  %p319_p10 = scmp.lt.s32.totalorder (!%p271_p9), %s850_s16, 24 }
  0x12   : > { %s775_s20 = scalar_lea.hbm (!%p271_p9), %s1300_s7, %s1085_s6  ;;  %s976_s6 = scalar_lea.hbm (!%p271_p9), %s1300_s7, 2 }
  0x13   : > { %s779_s23 = sshll.u32 (!%p271_p9), %s775_s20, 4  ;;  %s780_s23 = int_to_ptr.hbm [resolvable:$true] %s779_s23 }
  0x14   : > { %s970_s25 = sshra.s32 (!%p271_p9), %s780_s23, 4  ;;  %s971_s25 = int_to_ptr.hbm [resolvable:$true] %s970_s25 }
  0x15   : > { %s972_s30 = scalar_lea.hbm (!%p271_p9), %s971_s25, 1  ;;  %p977_p0 = scmp.lt.s32.totalorder (!%p271_p9), %s971_s25, %s1300_s7 }
  0x16   : > { %v376_v1 = vld [vmem:[%s1296_s3] sm:$0xf]  ;;  %vm426_vm0 = vcmask 1043456   ;;  %v359_v2 = vld [vmem:[%s1295_s2 + $0x8] sm:$0xf]  ;;  %s1308_s16 = smov (!%p319_p10, %s850_s16), 24  ;;  %p973_p11 = scmp.ne.s32.totalorder %s971_s25, %s972_s30 }
  0x17   : > { %854 = vmatpush.msk.msra.mxu0 %vm426_vm0, %v376_v1  ;;  %907 = vmatpush.msk.msra.mxu3 %vm426_vm0, %v376_v1  ;;  %v358_v3 = vld [vmem:[%s1295_s2] sm:$0xff]  ;;  %s851_s21 = sshll.u32 %s1308_s16, 3  ;;  %vm377_vm1 = vcmask 31744   ;;  %vm495_vm2 = vcmask 97280   ;;  %vm688_vm4 = vcmask 261120   ;;  %p978_p1 = scmp.lt.s32.totalorder %s976_s6, %s972_s30 }
  0x18   : > { %871 = vmatpush.msk.msra.mxu1 %vm426_vm0, %v359_v2  ;;  %s1125_s24 = scalar_lea.vmem %s1294_s1, %s851_s21  ;;  %s1130_s9 = scalar_lea.vmem %s1293_s0, %s851_s21 }
  0x19   : > { %908 = vmatpush.msk.msrb.mxu3 %vm426_vm0, %v359_v2  ;;  %v360_v4 = vld [vmem:[%s1125_s24] sm:$0xff]  ;;  %v371_v5 = vld [vmem:[%s1125_s24 + $0x58] sm:$0xff]  ;;  %v361_v7 = vld [vmem:[%s1125_s24 + $0x8] sm:$0xff]  ;;  %s313_s21 = scalar_lea.vmem [#allocation3], %s312_s17  ;;  %p974_p12 = pnand %p973_p11, %p1102_p5 }
  0x1a   : > { %562 = vmatpush.msra.mxu1 %v358_v3  ;;  %855 = vmatmul.msk.f32.vlgmr.msra.gmra.mxu0 %vm377_vm1, %v360_v4  ;;  %v342_v6 = vld [vmem:[%s1130_s9] sm:$0xff]  ;;  %v343_v9 = vld [vmem:[%s1130_s9 + $0x8] sm:$0xff]  ;;  %v362_v10 = vld [vmem:[%s1125_s24 + $0x10] sm:$0xff]  ;;  %s777_s22 = sshll.u32 %s313_s21, 4  ;;  %p979_p2 = por %p978_p1, %p977_p0  ;;  %s778_s22 = int_to_ptr.vmem [resolvable:$true] %s777_s22 }
  0x1b   : > { %909 = vmatpush.msrb.mxu3 %v358_v3  ;;  %872 = vmatmul.msk.f32.vlgmr.msra.gmra.mxu1 %vm495_vm2, %v342_v6  ;;  %v372_v8 = vld [vmem:[%s1125_s24 + $0x60] sm:$0xff]  ;;  %v373_v11 = vld [vmem:[%s1125_s24 + $0x68] sm:$0xff]  ;;  %v344_v12 = vld [vmem:[%s1130_s9 + $0x10] sm:$0xff]  ;;  %p975_p13 = pneg %p974_p12 }
  0x1c   : > { %866 = vmatmul.msk.f32.vlgmr.msra.gmra.mxu3 %vm377_vm1, %v371_v5  ;;  %v363_v13 = vld [vmem:[%s1125_s24 + $0x18] sm:$0xff]  ;;  %v374_v14 = vld [vmem:[%s1125_s24 + $0x70] sm:$0xff]  ;;  %v364_v16 = vld [vmem:[%s1125_s24 + $0x20] sm:$0xff] }
  0x1d   : > { %v345_v15 = vld [vmem:[%s1130_s9 + $0x18] sm:$0xff]  ;;  %v346_v18 = vld [vmem:[%s1130_s9 + $0x20] sm:$0xff]  ;;  %v365_v19 = vld [vmem:[%s1125_s24 + $0x28] sm:$0xff]  ;;  %p980_p3 = pnand %p979_p2, %p975_p13 }
  0x1e   : > { %v375_v17 = vld [vmem:[%s1125_s24 + $0x78] sm:$0xff]  ;;  %v352_v20 = vld [vmem:[%s1130_s9 + $0x50] sm:$0xff]  ;;  %v347_v21 = vld [vmem:[%s1130_s9 + $0x28] sm:$0xff] }
  0x1f   : > { %v366_v22 = vld [vmem:[%s1125_s24 + $0x30] sm:$0xff]  ;;  %v353_v23 = vld [vmem:[%s1130_s9 + $0x58] sm:$0xff]  ;;  %v354_v26 = vld [vmem:[%s1130_s9 + $0x60] sm:$0xff] }
  0x20   : > { %v348_v24 = vld [vmem:[%s1130_s9 + $0x30] sm:$0xff]  ;;  %v367_v25 = vld [vmem:[%s1125_s24 + $0x38] sm:$0xff]  ;;  %v368_v28 = vld [vmem:[%s1125_s24 + $0x40] sm:$0xff] }
  0x21   : > { %v349_v27 = vld [vmem:[%s1130_s9 + $0x38] sm:$0xff]  ;;  %v355_v29 = vld [vmem:[%s1130_s9 + $0x68] sm:$0xff]  ;;  %v350_v30 = vld [vmem:[%s1130_s9 + $0x40] sm:$0xff] }
  0x22   : > { %856 = vmatmul.msk.f32.gmra.mxu0 %vm377_vm1, %v361_v7  ;;  %v369_v31 = vld [vmem:[%s1125_s24 + $0x48] sm:$0xff]  ;;  %v356_v32 = vld [vmem:[%s1130_s9 + $0x70] sm:$0xff]  ;;  %v357_v35 = vld [vmem:[%s1130_s9 + $0x78] sm:$0xff] }
  0x23   : > { %873 = vmatmul.msk.f32.gmra.mxu1 %vm495_vm2, %v343_v9  ;;  %v351_v33 = vld [vmem:[%s1130_s9 + $0x48] sm:$0xff]  ;;  %v370_v34 = vld [vmem:[%s1125_s24 + $0x50] sm:$0xff]  ;;  %v1215_v5 = vld [vmem:[%s1297_s4] ss:$0 sm:$0xff]  ;;  %s767_s24 = scalar_lea.sflag [#allocation4], %s312_s17 }
  0x24   : > { %867 = vmatmul.msk.f32.gmra.mxu3 %vm377_vm1, %v372_v8 }
  0x2a   : > { %857 = vmatmul.msk.f32.gmra.mxu0 %vm377_vm1, %v362_v10 }
  0x2b   : > { %874 = vmatmul.msk.f32.gmra.mxu1 %vm495_vm2, %v344_v12 }
  0x2c   : > { %868 = vmatmul.msk.f32.gmra.mxu3 %vm377_vm1, %v373_v11 }
  0x32   : > { %858 = vmatmul.msk.f32.gmra.mxu0 %vm377_vm1, %v363_v13 }
  0x33   : > { %875 = vmatmul.msk.f32.gmra.mxu1 %vm495_vm2, %v345_v15 }
  0x34   : > { %869 = vmatmul.msk.f32.gmra.mxu3 %vm377_vm1, %v374_v14 }
  0x3a   : > { %859 = vmatmul.msk.f32.gmra.mxu0 %vm377_vm1, %v364_v16 }
  0x3b   : > { %876 = vmatmul.msk.f32.gmra.mxu1 %vm495_vm2, %v346_v18 }
  0x3c   : > { %870 = vmatmul.msk.f32.gmra.mxu3 %vm377_vm1, %v375_v17 }
  0x42   : > { %860 = vmatmul.msk.f32.gmra.mxu0 %vm377_vm1, %v365_v19 }
  0x43   : > { %877 = vmatmul.msk.f32.gmra.mxu1 %vm495_vm2, %v347_v21 }
  0x44   : > { %882 = vmatmul.msk.f32.vlgmr.msrb.gmra.mxu3 %vm495_vm2, %v352_v20 }
  0x4a   : > { %861 = vmatmul.msk.f32.gmra.mxu0 %vm377_vm1, %v366_v22 }
  0x4b   : > { %878 = vmatmul.msk.f32.gmra.mxu1 %vm495_vm2, %v348_v24 }
  0x4c   : > { %883 = vmatmul.msk.f32.gmra.mxu3 %vm495_vm2, %v353_v23 }
  0x52   : > { %862 = vmatmul.msk.f32.gmra.mxu0 %vm377_vm1, %v367_v25 }
  0x53   : > { %879 = vmatmul.msk.f32.gmra.mxu1 %vm495_vm2, %v349_v27 }
  0x54   : > { %884 = vmatmul.msk.f32.gmra.mxu3 %vm495_vm2, %v354_v26 }
  0x5a   : > { %863 = vmatmul.msk.f32.gmra.mxu0 %vm377_vm1, %v368_v28 }
  0x5b   : > { %880 = vmatmul.msk.f32.gmra.mxu1 %vm495_vm2, %v350_v30 }
  0x5c   : > { %885 = vmatmul.msk.f32.gmra.mxu3 %vm495_vm2, %v355_v29 }
  0x62   : > { %864 = vmatmul.msk.f32.gmra.mxu0 %vm377_vm1, %v369_v31 }
  0x63   : > { %881 = vmatmul.msk.f32.gmra.mxu1 %vm495_vm2, %v351_v33 }
  0x64   : > { %886 = vmatmul.msk.f32.gmra.mxu3 %vm495_vm2, %v356_v32 }
  0x6a   : > { %865 = vmatmul.msk.f32.gmra.mxu0 %vm377_vm1, %v370_v34 }
  0x6c   : > { %887 = vmatmul.msk.f32.gmra.mxu3 %vm495_vm2, %v357_v35 }
  0x97   : > { %v447_v36 = vpop.f32.mrf.mxu0 }
  0x98   : > { %v564_v37 = vpop.f32.mrf.mxu1 }
  0x99   : > { %v1196_v38 = vadd.f32 %v564_v37, %v447_v36 }
  0x9f   : > { %v480_v39 = vpop.f32.mrf.mxu3  ;;  %v450_v40 = vpop.f32.mrf.mxu0 }
  0xa0   : > { %v567_v41 = vpop.f32.mrf.mxu1 }
  0xa1   : > { %v1198_v42 = vadd.f32 %v567_v41, %v450_v40 }
  0xa7   : > { %v483_v43 = vpop.f32.mrf.mxu3  ;;  %v453_v44 = vpop.f32.mrf.mxu0 }
  0xa8   : > { %v570_v45 = vpop.f32.mrf.mxu1 }
  0xa9   : > { %v1200_v46 = vadd.f32 %v570_v45, %v453_v44 }
  0xaf   : > { %v486_v47 = vpop.f32.mrf.mxu3  ;;  %v456_v48 = vpop.f32.mrf.mxu0 }
  0xb0   : > { %v573_v49 = vpop.f32.mrf.mxu1 }
  0xb1   : > { %v1202_v50 = vadd.f32 %v573_v49, %v456_v48 }
  0xb7   : > { %v489_v51 = vpop.f32.mrf.mxu3  ;;  %v1204_v52 = vpop.f32.mrf.mxu0 }
  0xb8   : > { %v1208_v56 = vpop.f32.mrf.mxu1 }
  0xbf   : > { %v492_v53 = vpop.f32.mrf.mxu3  ;;  %v1206_v55 = vpop.f32.mrf.mxu0 }
  0xc0   : > { %v1210_v60 = vpop.f32.mrf.mxu1 }
  0xc1   : > { %v580_v45 = vadd.f32 %v1210_v60, %v1206_v55 }
  0xc7   : > { %v594_v54 = vpop.f32.mrf.mxu3  ;;  %v465_v58 = vpop.f32.mrf.mxu0 }
  0xc8   : > { %v582_v63 = vpop.f32.mrf.mxu1 }
  0xc9   : > { %v583_v40 = vadd.f32 %v582_v63, %v465_v58  ;;  %v681_v58 = vld [vmem:[#allocation2] sm:$0x1]  ;;  %v618_v63 = vadd.f32 %v1215_v5, %v1200_v46 }
  0xcb   : > { %vm634_vm1 = vcmp.gt.f32.partialorder %v618_v63, 0.0 }
  0xcf   : > { %v597_v57 = vpop.f32.mrf.mxu3  ;;  %v468_v61 = vpop.f32.mrf.mxu0 }
  0xd0   : > { %v585_v2 = vpop.f32.mrf.mxu1  ;;  %v598_v17 = vadd.f32 %v597_v57, %v480_v39 }
  0xd1   : > { %v586_v35 = vadd.f32 %v585_v2, %v468_v61  ;;  %v617_v2 = vadd.f32 %v1215_v5, %v1198_v42 }
  0xd2   : > { %v627_v22 = vadd.f32 %v1215_v5, %v598_v17 }
  0xd3   : > { %v623_v41 = vadd.f32 %v1215_v5, %v586_v35  ;;  %vm633_vm2 = vcmp.gt.f32.partialorder %v617_v2, 0.0 }
  0xd4   : > { %v659_v30 = vmul.f32 0.01, %v627_v22  ;;  %vm643_vm8 = vcmp.gt.f32.partialorder %v627_v22, 0.0 }
  0xd5   : > { %v655_v49 = vmul.f32 0.01, %v623_v41  ;;  %vm639_vm12 = vcmp.gt.f32.partialorder %v623_v41, 0.0 }
  0xd6   : > { %v675_v33 = vsel %vm643_vm8, %v627_v22, %v659_v30 }
  0xd7   : > { %v600_v59 = vpop.f32.mrf.mxu3  ;;  %v471_v0 = vpop.f32.mrf.mxu0 }
  0xd8   : > { %v588_v12 = vpop.f32.mrf.mxu1  ;;  %v601_v13 = vadd.f32 %v600_v59, %v483_v43  ;;  %v1020_v59 = vmov 0  }
  0xd9   : > { %v589_v31 = vadd.f32 %v588_v12, %v471_v0  ;;  %950 = vset.pattern.permute.xlu0 %v1020_v59 }
  0xda   : > { %v628_v18 = vadd.f32 %v1215_v5, %v601_v13  ;;  %684 = vperm.xlu0 %950, %v681_v58  }
  0xdb   : > { %v624_v36 = vadd.f32 %v1215_v5, %v589_v31 }
  0xdc   : > { %v660_v25 = vmul.f32 0.01, %v628_v18  ;;  %vm644_vm7 = vcmp.gt.f32.partialorder %v628_v18, 0.0 }
  0xdd   : > { %v656_v44 = vmul.f32 0.01, %v624_v36  ;;  %vm640_vm11 = vcmp.gt.f32.partialorder %v624_v36, 0.0 }
  0xde   : > { %v676_v29 = vsel %vm644_vm7, %v628_v18, %v660_v25 }
  0xdf   : > { %v603_v62 = vpop.f32.mrf.mxu3  ;;  %v474_v7 = vpop.f32.mrf.mxu0  ;;  %v672_v48 = vsel %vm640_vm11, %v624_v36, %v656_v44 }
  0xe0   : > { %v604_v8 = vadd.f32 %v603_v62, %v486_v47  ;;  %v591_v26 = vpop.f32.mrf.mxu1  ;;  %v622_v47 = vadd.f32 %v1215_v5, %v583_v40 }
  0xe1   : > { %v592_v28 = vadd.f32 %v591_v26, %v474_v7  ;;  %v649_v7 = vmul.f32 0.01, %v617_v2 }
  0xe2   : > { %v629_v14 = vadd.f32 %v1215_v5, %v604_v8  ;;  %v654_v57 = vmul.f32 0.01, %v622_v47  ;;  %vm638_vm13 = vcmp.gt.f32.partialorder %v622_v47, 0.0 }
  0xe3   : > { %v625_v32 = vadd.f32 %v1215_v5, %v592_v28  ;;  %v665_v46 = vsel %vm633_vm2, %v617_v2, %v649_v7 }
  0xe4   : > { %v661_v20 = vmul.f32 0.01, %v629_v14  ;;  %vm645_vm6 = vcmp.gt.f32.partialorder %v629_v14, 0.0  ;;  %v670_v60 = vsel %vm638_vm13, %v622_v47, %v654_v57 }
  0xe5   : > { %v657_v39 = vmul.f32 0.01, %v625_v32  ;;  %vm641_vm10 = vcmp.gt.f32.partialorder %v625_v32, 0.0 }
  0xe6   : > { %v677_v24 = vsel %vm645_vm6, %v629_v14, %v661_v20 }
  0xe7   : > { %v606_v1 = vpop.f32.mrf.mxu3  ;;  %v477_v21 = vpop.f32.mrf.mxu0  ;;  %v673_v43 = vsel %vm641_vm10, %v625_v32, %v657_v39 }
  0xe8   : > { %v607_v3 = vadd.f32 %v606_v1, %v489_v51  ;;  %v595_v23 = vadd.f32 %v594_v54, %v477_v21  ;;  %v577_v51 = vadd.f32 %v1208_v56, %v1204_v52  ;;  %v671_v54 = vsel %vm639_vm12, %v623_v41, %v655_v49 }
  0xe9   : > { %v619_v52 = vadd.f32 %v1215_v5, %v1202_v50  ;;  %v616_v50 = vadd.f32 %v1215_v5, %v1196_v38 }
  0xea   : > { %v630_v9 = vadd.f32 %v1215_v5, %v607_v3  ;;  %v626_v27 = vadd.f32 %v1215_v5, %v595_v23  ;;  %v620_v55 = vadd.f32 %v1215_v5, %v577_v51 }
  0xeb   : > { %v651_v1 = vmul.f32 0.01, %v619_v52  ;;  %vm635_vm0 = vcmp.gt.f32.partialorder %v619_v52, 0.0  ;;  %v648_v8 = vmul.f32 0.01, %v616_v50 }
  0xec   : > { %v662_v16 = vmul.f32 0.01, %v630_v9  ;;  %vm646_vm5 = vcmp.gt.f32.partialorder %v630_v9, 0.0  ;;  %v658_v34 = vmul.f32 0.01, %v626_v27  ;;  %vm642_vm9 = vcmp.gt.f32.partialorder %v626_v27, 0.0 }
  0xed   : > { %v652_v62 = vmul.f32 0.01, %v620_v55  ;;  %vm636_vm15 = vcmp.gt.f32.partialorder %v620_v55, 0.0  ;;  %v667_v3 = vsel %vm635_vm0, %v619_v52, %v651_v1 }
  0xee   : > { %v678_v19 = vsel %vm646_vm5, %v630_v9, %v662_v16  ;;  %v674_v37 = vsel %vm642_vm9, %v626_v27, %v658_v34  ;;  %v680_v9 = vld [vmem:[%s1298_s5] sm:$0x1] }
  0xef   : > { %v609_v4 = vpop.f32.mrf.mxu3  ;;  %v668_v0 = vsel %vm636_vm15, %v620_v55, %v652_v62 }
  0xf0   : > { %v610_v6 = vadd.f32 %v609_v4, %v492_v53  ;;  %v621_v53 = vadd.f32 %v1215_v5, %v580_v45  ;;  %v650_v4 = vmul.f32 0.01, %v618_v63 }
  0xf2   : > { %v631_v10 = vadd.f32 %v1215_v5, %v610_v6  ;;  %v653_v61 = vmul.f32 0.01, %v621_v53  ;;  %vm637_vm14 = vcmp.gt.f32.partialorder %v621_v53, 0.0  ;;  %v666_v6 = vsel %vm634_vm1, %v618_v63, %v650_v4 }
  0xf4   : > { %vm647_vm3 = vcmp.gt.f32.partialorder %v631_v10, 0.0  ;;  %v663_v11 = vmul.f32 0.01, %v631_v10  ;;  %v669_v56 = vsel %vm637_vm14, %v621_v53, %v653_v61 }
  0xf6   : > { %v679_v15 = vsel %vm647_vm3, %v631_v10, %v663_v11  ;;  %vm632_vm3 = vcmp.gt.f32.partialorder %v616_v50, 0.0 }
  0xf7   : > { %888 = vmatpush.xpose.msk.msra.mxu2 %vm688_vm4, %v679_v15  ;;  %v664_v42 = vsel %vm632_vm3, %v616_v50, %v648_v8 }
  0xfb   : > { %889 = vmatpush.xpose.msk.msra.mxu2 %vm688_vm4, %v678_v19 }
  0xff   : > { %890 = vmatpush.xpose.msk.msra.mxu2 %vm688_vm4, %v677_v24 }
 0x103   : > { %891 = vmatpush.xpose.msk.msra.mxu2 %vm688_vm4, %v676_v29 }
 0x107   : > { %892 = vmatpush.xpose.msk.msra.mxu2 %vm688_vm4, %v675_v33 }
 0x10b   : > { %893 = vmatpush.xpose.msk.msra.mxu2 %vm688_vm4, %v674_v37 }
 0x10f   : > { %894 = vmatpush.xpose.msk.msra.mxu2 %vm688_vm4, %v673_v43 }
 0x113   : > { %895 = vmatpush.xpose.msk.msra.mxu2 %vm688_vm4, %v672_v48 }
 0x117   : > { %896 = vmatpush.xpose.msk.msra.mxu2 %vm688_vm4, %v671_v54 }
 0x11b   : > { %897 = vmatpush.xpose.msk.msra.mxu2 %vm688_vm4, %v670_v60 }
 0x11f   : > { %898 = vmatpush.xpose.msk.msra.mxu2 %vm688_vm4, %v669_v56 }
 0x123   : > { %899 = vmatpush.xpose.msk.msra.mxu2 %vm688_vm4, %v668_v0 }
 0x127   : > { %900 = vmatpush.xpose.msk.msra.mxu2 %vm688_vm4, %v667_v3 }
 0x12b   : > { %901 = vmatpush.xpose.msk.msra.mxu2 %vm688_vm4, %v666_v6 }
 0x12f   : > { %902 = vmatpush.xpose.msk.msra.mxu2 %vm688_vm4, %v665_v46 }
 0x133   : > { %903 = vmatpush.xpose.msk.msra.mxu2 %vm688_vm4, %v664_v42 }
 0x136   : > { %904 = vmatmul.msk.f32.vlgmr.msra.gmra.mxu2 %vm688_vm4, %v680_v9 }
 0x14c   : > { %v685_v38 = vpop.permute.xlu0 %684 }
 0x14d   : > { %v687_v5 = vperm.slane %v685_v38, 0 }
 0x1b9   : > { %v757_v10 = vpop.f32.mrf.mxu2 }
 0x1ba   : > { %v758_v11 = vadd.f32 %v757_v10, %v687_v5 }
 0x1bc   : > { %v760_v12 = vsub.f32 0.0, %v758_v11 }
 0x1be   : > { %v761_v13 = vmul.f32 1.442695, %v760_v12 }
 0x1c0   : > { %952 = vpow2.f32 %v761_v13 }
 0x1c6   : > { %v953_v14 = vpop.eup %952 }
 0x1c7   : > { %v763_v15 = vadd.f32 1.0, %v953_v14 }
 0x1c9   : > { %954 = vrcp.f32 %v763_v15 }
 0x1cf   : > { %v955_v16 = vpop.eup %954 }
 0x1d0   : > { %765 = vst [vmem:[%s313_s21] sm:$0x1] %v955_v16 }
 0x1d1   : > { %983 = shalt.err (!%p980_p3)
}
 0x1d2   : > { %910 = dma.vmem_to_hbm [thread:$0]  (%p1102_p5), %s778_s22, 16, %s780_s23, %s767_s24  }
 0x1d3 PF: > { %p916_p4 = scmp.ge.s32.totalorder %s1018_s29, 2  ;;  %s791_s16 = sand.u32 1, %s1006_s26  }
 0x1d4   : > { %s792_s17 = scalar_lea.sflag [#allocation4], %s791_s16 }
 0x1d5   : > { %p913_p7 = pnand %p916_p4, %p1106_p6 }
 0x1d7   : > { %p914_p8 = pneg %p913_p7 }
 0x1d9   : > { %1001 = dma.done.wait (%p914_p8), %s792_s17, 16  }
 0x1da   : > { %1003 = vsyncadd (%p914_p8), %s792_s17, 4294967280  ;;  %p19_p9 = scmp.ge.s32.totalorder %s1089_s8, 4   ;;  %s1303_s26 = smov %s1010_s27 }
 0x1db   : > { %s1304_s27 = smov %s1014_s28  ;;  %s1305_s28 = smov %s1100_s11 }
 0x1dc   : > { %s1306_s29 = smov %s1089_s8  ;;  %21 = sbr.rel (!%p19_p9) target bundleno = 6 (0x6), region = 86 }
 0x1e1   :  { %797 = vsyncpa [#allocation4], 1 }
 0x1e2   :  { %799 = vsyncpa [#allocation4 + $0x1], 1 }

</bundles_post_ra>
